<compile_context>
chip_gen: v5e
topology: v5e:2x2
jax: 0.10.0
libtpu: 0.0.40
codegen_flags: <defaults>
</compile_context>

<pallas_src>
import functools

import jax
import jax.numpy as jnp
import numpy as np
from jax.experimental import pallas as pl
from jax.experimental.pallas import tpu as pltpu


# ---------------------------------------------------------------------------
# Pallas kernel: one grid step = one (tb, td) slab of the flattened samples.
# ---------------------------------------------------------------------------
def _drop_path_kernel(u_ref, x_ref, o_ref, *, keep_prob, tb):
    # u_ref holds ALL per-sample uniforms (B_pad, 1), fetched once (constant
    # index_map). Slice the rows belonging to this batch tile.
    i = pl.program_id(0)
    r0 = pl.multiple_of(i * tb, tb)
    u = u_ref[pl.ds(r0, tb), :]                              # (tb, 1) f32
    # Binarize + fold the 1/keep_prob rescale into the per-row scale (f32).
    scale = jnp.floor(keep_prob + u) * (1.0 / keep_prob)     # (tb, 1) f32
    # Multiply in f32, cast only the final product (kernel is HBM-bound).
    o_ref[...] = (x_ref[...].astype(jnp.float32) * scale).astype(o_ref.dtype)


# ---------------------------------------------------------------------------
# Wrapper (mirrors DropPath.forward)
# ---------------------------------------------------------------------------
def drop_path_forward(x, *, drop_prob, training, rng_key):
    # Identity short-circuit, exactly as the PyTorch module (eval / p==0/None).
    if (drop_prob is None) or (float(drop_prob) == 0.0) or (not training):
        return x

    keep_prob = 1.0 - float(drop_prob)
    if keep_prob == 0.0:
        # drop_prob == 1.0 drops every sample; avoid the 0 * inf NaN of the
        # literal divide-by-keep_prob formula.
        return jnp.zeros_like(x)

    orig_shape = x.shape
    B = x.shape[0]
    x2 = x.reshape(B, -1)                       # (B, D) lane-dense rows
    D = x2.shape[1]

    itemsize = jnp.dtype(x.dtype).itemsize
    sub = 8 * max(1, 4 // itemsize)             # sublane pack: 8 f32 / 16 bf16 / 32 i8

    # Pad so both axes tile cleanly (graceful handling of any B / D).
    B_pad = ((B + sub - 1) // sub) * sub
    D_pad = ((D + 127) // 128) * 128
    if (B_pad != B) or (D_pad != D):
        x2 = jnp.pad(x2, ((0, B_pad - B), (0, D_pad - D)))

    # Per-sample uniforms (analogue of torch.rand((B, 1, ..., 1))).
    u = jax.random.uniform(rng_key, (B, 1), dtype=jnp.float32)
    if B_pad != B:
        u = jnp.pad(u, ((0, B_pad - B), (0, 0)))

    # Tile selection: ~2 MiB tiles (measured elementwise sweet spot); the
    # double-buffered in+out working set (~4x tile + uniforms) stays well
    # under the scoped-VMEM budget on every generation (v7x: 64 MiB physical).
    TILE_BYTES = 2 << 20
    td = 128
    while D_pad % (td * 2) == 0 and sub * (td * 2) * itemsize <= TILE_BYTES:
        td *= 2
    tb = sub
    while B_pad % (tb * 2) == 0 and (tb * 2) * td * itemsize <= TILE_BYTES:
        tb *= 2
    # Guarantee >= 2 grid steps so v7x's two TensorCores both get work.
    while (B_pad // tb) * (D_pad // td) < 2:
        if tb > sub:
            tb //= 2
        elif td > 128:
            td //= 2
        else:
            break

    kernel = functools.partial(_drop_path_kernel, keep_prob=keep_prob, tb=tb)

    grid_spec = pltpu.PrefetchScalarGridSpec(
        num_scalar_prefetch=0,
        grid=(B_pad // tb, D_pad // td),
        in_specs=[
            # Uniforms: full array, constant block index -> DMA'd once.
            pl.BlockSpec((B_pad, 1), lambda i, j: (0, 0)),
            # x rows: one (tb, td) tile per grid step.
            pl.BlockSpec((tb, td), lambda i, j: (i, j)),
        ],
        out_specs=pl.BlockSpec((tb, td), lambda i, j: (i, j)),
    )

    out = pl.pallas_call(
        kernel,
        out_shape=jax.ShapeDtypeStruct((B_pad, D_pad), x.dtype),
        grid_spec=grid_spec,
        compiler_params=pltpu.CompilerParams(
            dimension_semantics=("parallel", "parallel"),
            vmem_limit_bytes=32 * 1024 * 1024),
    )(u, x2)

    if (B_pad != B) or (D_pad != D):
        out = out[:B, :D]
    return out.reshape(orig_shape)


# ---------------------------------------------------------------------------
# Pure-JAX reference (mirrors the PyTorch drop_path exactly; same RNG draw)
# ---------------------------------------------------------------------------
def drop_path_reference(x, drop_prob, training, rng_key):
    if (drop_prob is None) or (float(drop_prob) == 0.0) or (not training):
        return x
    keep_prob = 1.0 - float(drop_prob)
    B = x.shape[0]
    u = jax.random.uniform(rng_key, (B, 1), dtype=jnp.float32)
    mask = jnp.floor(keep_prob + u).reshape((B,) + (1,) * (x.ndim - 1))
    return x / keep_prob * mask.astype(x.dtype)


# ---------------------------------------------------------------------------
# Main
# ---------------------------------------------------------------------------
if __name__ == "__main__":
    drop_prob = 0.25
    key = jax.random.PRNGKey(0)

    # Case 1: ViT-token-style input, nicely aligned (B, N, C) = (8, 16, 256).
    kx, ku, key = jax.random.split(key, 3)
    x = jax.random.normal(kx, (8, 16, 256), dtype=jnp.float32)
    out = jax.block_until_ready(
        drop_path_forward(x, drop_prob=drop_prob, training=True, rng_key=ku))
    ref = drop_path_reference(x, drop_prob, True, ku)
    np.testing.assert_allclose(np.asarray(out), np.asarray(ref),
                               rtol=1e-5, atol=1e-6)

    # Case 2: awkward shapes (B not multiple of 8, D not multiple of 128)
    # exercise the padding path instead of a single-giant-block fallback.
    kx2, ku2, key = jax.random.split(key, 3)
    x2 = jax.random.normal(kx2, (5, 7, 48), dtype=jnp.float32)
    out2 = jax.block_until_ready(
        drop_path_forward(x2, drop_prob=drop_prob, training=True, rng_key=ku2))
    ref2 = drop_path_reference(x2, drop_prob, True, ku2)
    np.testing.assert_allclose(np.asarray(out2), np.asarray(ref2),
                               rtol=1e-5, atol=1e-6)

    # Case 3: eval mode is the identity, as in the PyTorch module.
    out_eval = drop_path_forward(x, drop_prob=drop_prob, training=False,
                                 rng_key=ku)
    np.testing.assert_allclose(np.asarray(out_eval), np.asarray(x))

    print("KERNEL_OK")
</pallas_src>

<mosaic_0001>
module attributes {stable_mosaic.version = 11 : i64} {
  func.func @_drop_path_kernel(%arg0: i32, %arg1: i32, %arg2: memref<8x1xf32, #tpu.memory_space<vmem>>, %arg3: memref<8x2048xf32, #tpu.memory_space<vmem>>, %arg4: memref<8x2048xf32, #tpu.memory_space<vmem>>) attributes {dimension_semantics = [#tpu.dimension_semantics<parallel>, #tpu.dimension_semantics<parallel>], iteration_bounds = array<i64: 1, 2>, scalar_prefetch = 0 : i64, scratch_operands = 0 : i64, tpu.core_type = #tpu.core_type<tc>, window_params = [{pipeline_mode = #tpu.pipeline_mode<synchronous>, transform_indices = @transform_0, window_bounds = array<i64: 8, 1>}, {transform_indices = @transform_1, window_bounds = array<i64: 8, 2048>}, {transform_indices = @transform_2, window_bounds = array<i64: 8, 2048>}]} {
    %c8_i32 = arith.constant 8 : i32
    %0 = arith.muli %arg0, %c8_i32 : i32
    %1 = tpu.assume_multiple %0, 8 : i32
    %2 = arith.index_cast %1 : i32 to index
    %c0 = arith.constant 0 : index
    %3 = vector.load %arg2[%2, %c0] : memref<8x1xf32, #tpu.memory_space<vmem>>, vector<8x1xf32>
    %cst = arith.constant 7.500000e-01 : f32
    %4 = vector.broadcast %cst : f32 to vector<8x1xf32>
    %5 = arith.addf %4, %3 : vector<8x1xf32>
    %6 = math.floor %5 : vector<8x1xf32>
    %cst_0 = arith.constant 1.33333337 : f32
    %7 = vector.broadcast %cst_0 : f32 to vector<8x1xf32>
    %8 = arith.mulf %6, %7 : vector<8x1xf32>
    %c0_1 = arith.constant 0 : index
    %c0_2 = arith.constant 0 : index
    %9 = vector.load %arg3[%c0_1, %c0_2] : memref<8x2048xf32, #tpu.memory_space<vmem>>, vector<8x2048xf32>
    %10 = vector.broadcast %8 : vector<8x1xf32> to vector<8x2048xf32>
    %11 = arith.mulf %9, %10 : vector<8x2048xf32>
    %c0_3 = arith.constant 0 : index
    %c0_4 = arith.constant 0 : index
    %12 = vector.load %arg4[%c0_3, %c0_4] : memref<8x2048xf32, #tpu.memory_space<vmem>>, vector<8x2048xf32>
    tpu.vector_store %arg4[%c0_3, %c0_4], %11 {strides = array<i32>} : memref<8x2048xf32, #tpu.memory_space<vmem>>, vector<8x2048xf32>,
    return
  }
  func.func @transform_0(%arg0: i32, %arg1: i32) -> (i32, i32) {
    %c0_i32 = arith.constant 0 : i32
    %c0_i32_0 = arith.constant 0 : i32
    %c0_i32_1 = arith.constant 0 : i32
    return %c0_i32, %c0_i32_0 : i32, i32
  }
  func.func @transform_1(%arg0: i32, %arg1: i32) -> (i32, i32) {
    %c0_i32 = arith.constant 0 : i32
    return %arg0, %arg1 : i32, i32
  }
  func.func @transform_2(%arg0: i32, %arg1: i32) -> (i32, i32) {
    %c0_i32 = arith.constant 0 : i32
    return %arg0, %arg1 : i32, i32
  }
}

</mosaic_0001>

<bundles_post_ra>
// kernel: tpu_custom_call.1
= control target key start
LH: loop header
LB: loop body
LE: loop exit
PB: predicated region body
PF: predicated region fallthrough
CT: control target
= control target key end

     0   :  { %7 = vsyncpa [#allocation3], 0  ;;  %s717_s0 = inlined_call_operand.vmem [shape: f32[8,1], index: 0, kind: input, shape index: {}]   ;;  %s718_s1 = inlined_call_operand.hbm [shape: f32[8,4096], index: 1, kind: input, shape index: {}]   ;;  %s719_s2 = inlined_call_operand.hbm [shape: f32[8,4096], index: 2, kind: output, shape index: {}]  }
   0x1   :  { %9 = vsyncpa [#allocation3 + $0x1], 0 }
   0x2   :  { %10 = vsyncpa [#allocation4], 0 }
   0x3   :  { %12 = vsyncpa [#allocation4 + $0x1], 0  ;;  %s557_s9 = smov 0   ;;  %s559_s10 = smov 0  }
   0x4   :  { %s561_s11 = smov 0   ;;  %s563_s12 = smov 0  }
   0x5   :  { %s565_s13 = smov 0   ;;  %s567_s14 = smov 0  }
   0x6 LB: > { %s346_s15 = sadd.s32 4294967295, %s539_s14   ;;  %s347_s16 = sadd.s32 4294967294, %s539_s14   ;;  %s539_s14 = sphi %s567_s14, %s18_s14   ;;  %s535_s13 = sphi %s565_s13, %s728_s13   ;;  %s531_s12 = sphi %s563_s12, %s727_s12   ;;  %s527_s11 = sphi %s561_s11, %s726_s11   ;;  %s523_s10 = sphi %s559_s10, %s725_s10   ;;  %s519_s9 = sphi %s557_s9, %s724_s9  }
   0x7   : > { %s27_s17 = sadd.s32 1, %s535_s13  ;;  %s60_s18 = sadd.s32 1, %s527_s11 }
   0x8   : > { %p28_p0 = scmp.ge.s32.totalorder %s27_s17, 2  ;;  %p67_p1 = scmp.ne.s32.totalorder %s527_s11, %s523_s10 }
   0x9   : > { %p68_p2 = scmp.eq.s32.totalorder %s539_s14, 0  ;;  %p73_p3 = scmp.ne.s32.totalorder %s523_s10, %s519_s9 }
   0xa   : > { %s730_s17 = smov (%p28_p0, %s27_s17), 0  ;;  %p74_p5 = scmp.eq.s32.totalorder %s346_s15, 0 }
   0xb   : > { %p598_p4 = por %p68_p2, %p67_p1  ;;  %s56_s20 = ssub.s32 %s535_s13, %s730_s17 }
   0xc   : > { %p99_p6 = scmp.eq.s32.totalorder %s346_s15, 1  ;;  %p58_p7 = scmp.eq.s32.totalorder %s56_s20, 0 }
   0xd   : > { %p604_p8 = por %p74_p5, %p73_p3  ;;  %p105_p10 = scmp.eq.s32.totalorder %s347_s16, 1 }
   0xe   : > { %p608_p9 = por %p99_p6, %p67_p1  ;;  %p349_p12 = scmp.ge.s32.totalorder %s539_s14, 2 }
   0xf   : > { %s613_s23 = scalar_select %p58_p7, %s527_s11, %s60_s18  }
  0x10   : > { %p615_p11 = por %p105_p10, %p73_p3  ;;  %p375_p13 = scmp.lt.s32.totalorder %s539_s14, 2 }
  0x11   : > { %s128_s25 = sand.u32 1, %s527_s11   ;;  %s361_s27 = sshll.u32 %s535_s13, 7 }
  0x12   : > { %s350_s26 = sshll.u32 %s128_s25, 7  ;;  %s139_s30 = scalar_lea.hbm %s718_s1, %s361_s27 }
  0x13   : > { %s132_s3 = scalar_lea.vmem [#allocation2], %s350_s26  ;;  %s141_s5 = sshll.u32 %s139_s30, 4  ;;  %s142_s5 = int_to_ptr.hbm [resolvable:$true] %s141_s5 }
  0x14   : > { %s143_s4 = sshll.u32 %s132_s3, 4  ;;  %p368_p0 = pnand %p375_p13, %p598_p4  ;;  %s144_s4 = int_to_ptr.vmem [resolvable:$true] %s143_s4 }
  0x15   : > { %p353_p1 = scmp.ge.s32.totalorder %s539_s14, 1  ;;  %p148_p2 = scmp.lt.s32.totalorder %s539_s14, 3 }
  0x16   : > { %s129_s6 = scalar_lea.sflag [#allocation3], %s128_s25 }
  0x17   : > { %370 = dma.hbm_to_vmem [thread:$0]  (!%p368_p0), %s142_s5, 2048, %s144_s4, %s129_s6  }
  0x18   : > { %p149_p3 = pnand %p353_p1, %p148_p2 }
  0x19   : > { %s631_s7 = sand.u32 (!%p149_p3), 1, %s523_s10  }
  0x1a   : > { %152 = sbr.rel (%p149_p3) target bundleno = 174 (0xae), region = 28  ;;  %s354_s8 = sshll.u32 (!%p149_p3), %s631_s7, 7 }
  0x1b   : > { %s155_s15 = scalar_lea.sflag (!%p149_p3), [#allocation3], %s631_s7  ;;  %s635_s16 = scalar_lea.vmem (!%p149_p3), [#allocation2], %s354_s8 }
  0x1f   : > { %510 = dma.done.wait (%p604_p8), %s155_s15, 2048  }
  0x20   : > { %512 = vsyncadd (%p604_p8), %s155_s15, 4294965248  ;;  %v541_v0 = vmov 0   ;;  %v184_v1 = vld [vmem:[%s717_s0] sm:$0xff]  ;;  %v189_v6 = vld [vmem:[%s635_s16 + $0x8] sm:$0xff]  ;;  %s652_s20 = scalar_lea.vmem [#allocation5], %s354_s8  ;;  %s362_s21 = sshll.u32 %s531_s12, 7 }
  0x21   : > { %426 = vset.pattern.permute.xlu0 %v541_v0  ;;  %v185_v2 = vadd.f32 0.75, %v184_v1  ;;  %v188_v5 = vld [vmem:[%s635_s16] sm:$0xff]  ;;  %v190_v7 = vld [vmem:[%s635_s16 + $0x10] sm:$0xff]  ;;  %v191_v8 = vld [vmem:[%s635_s16 + $0x18] sm:$0xff]  ;;  %s255_s27 = scalar_lea.hbm %s719_s2, %s362_s21  ;;  %s257_s12 = sshll.u32 %s652_s20, 4  ;;  %s258_s12 = int_to_ptr.vmem [resolvable:$true] %s257_s12 }
  0x22   : > { %v192_v9 = vld [vmem:[%s635_s16 + $0x20] sm:$0xff]  ;;  %v193_v11 = vld [vmem:[%s635_s16 + $0x28] sm:$0xff]  ;;  %v194_v15 = vld [vmem:[%s635_s16 + $0x30] sm:$0xff]  ;;  %s259_s28 = sshll.u32 %s255_s27, 4  ;;  %s242_s29 = scalar_lea.sflag [#allocation4], %s631_s7  ;;  %s260_s28 = int_to_ptr.hbm [resolvable:$true] %s259_s28 }
  0x23   : > { %v186_v3 = vfloor.f32 %v185_v2  ;;  %v195_v17 = vld [vmem:[%s635_s16 + $0x38] sm:$0xff]  ;;  %v196_v19 = vld [vmem:[%s635_s16 + $0x40] sm:$0xff]  ;;  %v197_v21 = vld [vmem:[%s635_s16 + $0x48] sm:$0xff]  ;;  %s471_s30 = sshra.s32 %s260_s28, 4  ;;  %s477_s6 = scalar_lea.hbm %s719_s2, 256  ;;  %s472_s30 = int_to_ptr.hbm [resolvable:$true] %s471_s30 }
  0x24   : > { %v198_v23 = vld [vmem:[%s635_s16 + $0x50] sm:$0xff]  ;;  %v199_v25 = vld [vmem:[%s635_s16 + $0x58] sm:$0xff]  ;;  %v200_v27 = vld [vmem:[%s635_s16 + $0x60] sm:$0xff]  ;;  %s473_s3 = scalar_lea.hbm %s472_s30, 128  ;;  %p478_p7 = scmp.lt.s32.totalorder %s472_s30, %s719_s2 }
  0x25   : > { %v187_v4 = vmul.f32 1.3333334, %v186_v3  ;;  %v201_v29 = vld [vmem:[%s635_s16 + $0x68] sm:$0xff]  ;;  %v202_v31 = vld [vmem:[%s635_s16 + $0x70] sm:$0xff]  ;;  %v203_v33 = vld [vmem:[%s635_s16 + $0x78] sm:$0xff]  ;;  %p474_p4 = scmp.ne.s32.totalorder %s472_s30, %s473_s3  ;;  %p479_p8 = scmp.lt.s32.totalorder %s477_s6, %s473_s3 }
  0x27   : > { %206 = vperm.xlu0 %426, %v187_v4   ;;  %p475_p5 = pnand %p474_p4, %p608_p9  ;;  %p480_p10 = por %p479_p8, %p478_p7 }
  0x29   : > { %p476_p6 = pneg %p475_p5 }
  0x2b   : > { %p481_p13 = pnand %p480_p10, %p476_p6 }
  0x99   : > { %v207_v10 = vpop.permute.xlu0 %206 }
  0x9a   : > { %v209_v12 = vmul.f32 %v207_v10, %v188_v5  ;;  %v210_v13 = vmul.f32 %v207_v10, %v189_v6  ;;  %v211_v14 = vmul.f32 %v207_v10, %v190_v7  ;;  %v212_v16 = vmul.f32 %v207_v10, %v191_v8 }
  0x9b   : > { %v213_v18 = vmul.f32 %v207_v10, %v192_v9  ;;  %v214_v20 = vmul.f32 %v207_v10, %v193_v11  ;;  %v215_v22 = vmul.f32 %v207_v10, %v194_v15  ;;  %v216_v24 = vmul.f32 %v207_v10, %v195_v17 }
  0x9c   : > { %225 = vst [vmem:[%s652_s20] sm:$0xff] %v209_v12  ;;  %v217_v26 = vmul.f32 %v207_v10, %v196_v19  ;;  %v218_v28 = vmul.f32 %v207_v10, %v197_v21  ;;  %v219_v30 = vmul.f32 %v207_v10, %v198_v23  ;;  %v220_v32 = vmul.f32 %v207_v10, %v199_v25 }
  0x9d   : > { %226 = vst [vmem:[%s652_s20 + $0x8] sm:$0xff] %v210_v13  ;;  %v221_v34 = vmul.f32 %v207_v10, %v200_v27  ;;  %v222_v35 = vmul.f32 %v207_v10, %v201_v29  ;;  %v223_v36 = vmul.f32 %v207_v10, %v202_v31  ;;  %v224_v37 = vmul.f32 %v207_v10, %v203_v33 }
  0x9e   : > { %227 = vst [vmem:[%s652_s20 + $0x10] sm:$0xff] %v211_v14 }
  0x9f   : > { %228 = vst [vmem:[%s652_s20 + $0x18] sm:$0xff] %v212_v16 }
  0xa0   : > { %229 = vst [vmem:[%s652_s20 + $0x20] sm:$0xff] %v213_v18 }
  0xa1   : > { %230 = vst [vmem:[%s652_s20 + $0x28] sm:$0xff] %v214_v20 }
  0xa2   : > { %231 = vst [vmem:[%s652_s20 + $0x30] sm:$0xff] %v215_v22 }
  0xa3   : > { %232 = vst [vmem:[%s652_s20 + $0x38] sm:$0xff] %v216_v24 }
  0xa4   : > { %233 = vst [vmem:[%s652_s20 + $0x40] sm:$0xff] %v217_v26 }
  0xa5   : > { %234 = vst [vmem:[%s652_s20 + $0x48] sm:$0xff] %v218_v28 }
  0xa6   : > { %235 = vst [vmem:[%s652_s20 + $0x50] sm:$0xff] %v219_v30 }
  0xa7   : > { %236 = vst [vmem:[%s652_s20 + $0x58] sm:$0xff] %v220_v32 }
  0xa8   : > { %237 = vst [vmem:[%s652_s20 + $0x60] sm:$0xff] %v221_v34 }
  0xa9   : > { %238 = vst [vmem:[%s652_s20 + $0x68] sm:$0xff] %v222_v35 }
  0xaa   : > { %239 = vst [vmem:[%s652_s20 + $0x70] sm:$0xff] %v223_v36 }
  0xab   : > { %240 = vst [vmem:[%s652_s20 + $0x78] sm:$0xff] %v224_v37 }
  0xac   : > { %484 = shalt.err (!%p481_p13)
}
  0xad   : > { %365 = dma.vmem_to_hbm [thread:$0]  (%p608_p9), %s258_s12, 2048, %s260_s28, %s242_s29  }
  0xae PF: > { %s271_s7 = sand.u32 1, %s519_s9   ;;  %p372_p0 = pnand %p349_p12, %p615_p11 }
  0xaf   : > { %s272_s16 = scalar_lea.sflag [#allocation4], %s271_s7 }
  0xb0   : > { %p373_p1 = pneg %p372_p0 }
  0xb2   : > { %514 = dma.done.wait (%p373_p1), %s272_s16, 2048  }
  0xb3   : > { %516 = vsyncadd (%p373_p1), %s272_s16, 4294965248  ;;  %s18_s14 = sadd.s32 1, %s539_s14   ;;  %s724_s9 = smov %s523_s10 }
  0xb4   : > { %p15_p2 = scmp.ge.s32.totalorder %s18_s14, 4   ;;  %s725_s10 = smov %s527_s11 }
  0xb5   : > { %s726_s11 = smov %s613_s23  ;;  %s727_s12 = smov %s535_s13 }
  0xb6   : > { %s728_s13 = smov %s730_s17  ;;  %17 = sbr.rel (!%p15_p2) target bundleno = 6 (0x6), region = 74 }
  0xbb   :  { %278 = vsyncpa [#allocation3], 1 }
  0xbc   :  { %280 = vsyncpa [#allocation3 + $0x1], 1 }
  0xbd   :  { %281 = vsyncpa [#allocation4], 1 }
  0xbe   :  { %283 = vsyncpa [#allocation4 + $0x1], 1 }

</bundles_post_ra>
